<compile_context>
chip_gen: v7x
topology: tpu7x:2x2x1
jax: 0.10.0
libtpu: 0.0.40
codegen_flags: <defaults>
</compile_context>

<pallas_src>
import jax
import jax.numpy as jnp
from jax.experimental import pallas as pl
from jax.experimental.pallas import tpu as pltpu


# ----------------------------------------------------------------------------
# Fused forward kernel. Input block (22, tile_n), output block (11, tile_n).
#   out rows 0:3   xyz     = _xyz + d_xyz
#   out rows 3:6   scales  = exp(_scaling + d_scaling)
#   out rows 6:10  rots    = L2-normalize(_rotation + d_rotation, eps=1e-12)
#   out row  10    opacity = sigmoid(_opacity)
# ----------------------------------------------------------------------------
def gaussian_fwd_kernel(p_ref, o_ref):
    p = p_ref[...]                      # (22, tile_n) f32
    base = p[0:11, :]                   # packed base params
    dfm = p[11:22, :]                   # packed deform offsets (row 10 is zero)
    s = base + dfm                      # (11, tile_n)

    # Inverse L2 norm over the rotation rows (explicit row adds, one EUP rsqrt;
    # no cross-lane/XLU reduce, no divide).  == 1 / max(||r||, 1e-12)
    r0 = s[6:7, :]
    r1 = s[7:8, :]
    r2 = s[8:9, :]
    r3 = s[9:10, :]
    n2 = r0 * r0 + r1 * r1 + r2 * r2 + r3 * r3          # (1, tile_n)
    inv = jax.lax.rsqrt(jnp.maximum(n2, 1e-24))

    # Build the full (11, tile_n) result with row masks and do ONE unmasked
    # full-tile store (no sublane-sliced masked vst).
    row = jax.lax.broadcasted_iota(jnp.int32, s.shape, 0)
    out = jnp.where(
        row < 3, s,
        jnp.where(
            row < 6, jnp.exp(s),
            jnp.where(row < 10, s * inv, jax.nn.sigmoid(s))))
    o_ref[...] = out


# ----------------------------------------------------------------------------
# Tile selection: biggest tile up to 32768 points while keeping >=4 grid steps
# (v7x 2-TC load balance); always a multiple of 128 lanes.
# ----------------------------------------------------------------------------
def choose_tile_n(n, *, max_tile=32768, min_tile=1024, min_steps=4):
    tile = max_tile
    while tile > min_tile and pl.cdiv(n, tile) < min_steps:
        tile //= 2
    return tile


# ----------------------------------------------------------------------------
# Packing helper — run ONCE at parameter-storage / parameter-update time.
# Produces the (22, n_pad) channel-major slab (point axis on lanes), already
# padded to a tile multiple with zeros (zeros are benign through every
# activation: exp(0)=1, sigmoid(0)=0.5, normalize clamps |r|=0 to 0).
# ----------------------------------------------------------------------------
def pack_params(xyz, scaling, rotation, opacity,
                d_xyz, d_scaling, d_rotation, *, tile_n):
    n = xyz.shape[0]
    zero_row = jnp.zeros((1, n), xyz.dtype)
    slab = jnp.concatenate(
        [xyz.T, scaling.T, rotation.T, opacity.T,          # base rows 0:11
         d_xyz.T, d_scaling.T, d_rotation.T, zero_row],    # deform rows 11:22
        axis=0)                                            # (22, n)
    n_pad = pl.cdiv(n, tile_n) * tile_n
    if n_pad != n:
        slab = jnp.pad(slab, ((0, 0), (0, n_pad - n)))
    return slab


# ----------------------------------------------------------------------------
# Fused Pallas forward (hot path).  Returns the channel-major (11, n_pad) slab
#   rows [xyz(3) | scales(3) | rots(4) | opacity(1)]
# plus the pass-through features / semantics (get_features is a no-op because
# the SH features are stored as one contiguous (N, (deg+1)^2, 3) parameter).
# ----------------------------------------------------------------------------
def gaussian_forward(packed_params, features, semantics, *, tile_n,
                     vmem_limit_bytes=48 * 1024 * 1024):
    c, n_pad = packed_params.shape
    assert c == 22, "packed_params must be the (22, N) slab from pack_params"
    assert tile_n % 128 == 0 and n_pad % tile_n == 0
    grid = (n_pad // tile_n,)

    packed_out = pl.pallas_call(
        gaussian_fwd_kernel,
        out_shape=jax.ShapeDtypeStruct((11, n_pad), jnp.float32),
        grid_spec=pl.GridSpec(
            grid=grid,
            in_specs=[pl.BlockSpec((22, tile_n), lambda i: (0, i))],
            out_specs=pl.BlockSpec((11, tile_n), lambda i: (0, i)),
        ),
        compiler_params=pltpu.CompilerParams(
            dimension_semantics=("parallel",),
            vmem_limit_bytes=vmem_limit_bytes),
    )(packed_params)

    return packed_out, features, semantics


# ----------------------------------------------------------------------------
# API-boundary helper (NOT on the hot path): split the packed output slab into
# the module's individual tensors, optionally back to (N, C) row-major.
# ----------------------------------------------------------------------------
def unpack_outputs(packed_out, n, *, row_major=False):
    xyz = packed_out[0:3, :n]
    scales = packed_out[3:6, :n]
    rots = packed_out[6:10, :n]
    opacity = packed_out[10:11, :n]
    if row_major:
        return xyz.T, scales.T, rots.T, opacity.T
    return xyz, scales, rots, opacity


# ----------------------------------------------------------------------------
# Pure-JAX reference (mirrors the PyTorch forward)
# ----------------------------------------------------------------------------
def reference_forward(xyz, d_xyz, scaling, d_scaling, rotation, d_rotation,
                      opacity, features, semantics):
    x = xyz + d_xyz
    s = jnp.exp(scaling + d_scaling)
    r = rotation + d_rotation
    r = r / jnp.maximum(jnp.linalg.norm(r, axis=-1, keepdims=True), 1e-12)
    o = jax.nn.sigmoid(opacity)
    # torch.cat((features_dc, features_rest), dim=1) == the contiguous param.
    f = jnp.concatenate((features[:, :1, :], features[:, 1:, :]), axis=1)
    return x, s, r, o, f, semantics


if __name__ == "__main__":
    # Deterministic synthetic parameter init (max_sh_degree=1, n_classes=7).
    N = 4096                     # number of gaussians (small test size)
    n_classes = 7
    max_sh_degree = 1
    n_coeffs = (max_sh_degree + 1) ** 2    # 4 SH coefficients

    key = jax.random.PRNGKey(0)
    ks = jax.random.split(key, 10)
    xyz = jax.random.normal(ks[0], (N, 3), jnp.float32)
    d_xyz = 0.01 * jax.random.normal(ks[1], (N, 3), jnp.float32)
    scaling = -2.0 + 0.1 * jax.random.normal(ks[2], (N, 3), jnp.float32)
    d_scaling = 0.01 * jax.random.normal(ks[3], (N, 3), jnp.float32)
    rotation = jnp.concatenate(
        [jnp.ones((N, 1), jnp.float32),
         0.1 * jax.random.normal(ks[4], (N, 3), jnp.float32)], axis=1)
    d_rotation = 0.01 * jax.random.normal(ks[5], (N, 4), jnp.float32)
    opacity = jax.random.normal(ks[6], (N, 1), jnp.float32)
    # One contiguous SH feature parameter: dc = [:, :1, :], rest = [:, 1:, :].
    features = jnp.concatenate(
        [jax.random.normal(ks[7], (N, 1, 3), jnp.float32),
         jnp.zeros((N, n_coeffs - 1, 3), jnp.float32)], axis=1)
    semantics = jax.random.uniform(ks[8], (N, n_classes), jnp.float32)

    # Storage-layout contract: packing (transpose + concat + pad) happens once
    # at parameter-update time, never per forward call.
    tile_n = choose_tile_n(N)
    packed_params = pack_params(xyz, scaling, rotation, opacity,
                                d_xyz, d_scaling, d_rotation, tile_n=tile_n)

    packed_out, feats_out, sem_out = gaussian_forward(
        packed_params, features, semantics, tile_n=tile_n)
    packed_out = jax.block_until_ready(packed_out)

    # ---- verification (API-boundary unpack + pure-JAX reference) ----
    out = unpack_outputs(packed_out, N, row_major=True) + (feats_out, sem_out)
    ref = reference_forward(xyz, d_xyz, scaling, d_scaling, rotation,
                            d_rotation, opacity, features, semantics)
    for a, b in zip(out, ref):
        assert a.shape == b.shape and a.dtype == b.dtype
        assert float(jnp.max(jnp.abs(a - b))) < 2e-5

    print("KERNEL_OK")
</pallas_src>

<mosaic_0001>
module attributes {stable_mosaic.version = 11 : i64} {
  func.func @gaussian_fwd_kernel(%arg0: i32, %arg1: memref<22x1024xf32, #tpu.memory_space<vmem>>, %arg2: memref<11x1024xf32, #tpu.memory_space<vmem>>) attributes {dimension_semantics = [#tpu.dimension_semantics<parallel>], iteration_bounds = array<i64: 4>, scalar_prefetch = 0 : i64, scratch_operands = 0 : i64, tpu.core_type = #tpu.core_type<tc>, window_params = [{transform_indices = @transform_0, window_bounds = array<i64: 22, 1024>}, {transform_indices = @transform_1, window_bounds = array<i64: 11, 1024>}]} {
    %c0 = arith.constant 0 : index
    %c0_0 = arith.constant 0 : index
    %0 = vector.load %arg1[%c0, %c0_0] : memref<22x1024xf32, #tpu.memory_space<vmem>>, vector<22x1024xf32>
    %1 = vector.extract_strided_slice %0 {offsets = [0, 0], sizes = [11, 1024], strides = [1, 1]} : vector<22x1024xf32> to vector<11x1024xf32>
    %2 = vector.extract_strided_slice %0 {offsets = [11, 0], sizes = [11, 1024], strides = [1, 1]} : vector<22x1024xf32> to vector<11x1024xf32>
    %3 = arith.addf %1, %2 : vector<11x1024xf32>
    %4 = vector.extract_strided_slice %3 {offsets = [6, 0], sizes = [1, 1024], strides = [1, 1]} : vector<11x1024xf32> to vector<1x1024xf32>
    %5 = vector.extract_strided_slice %3 {offsets = [7, 0], sizes = [1, 1024], strides = [1, 1]} : vector<11x1024xf32> to vector<1x1024xf32>
    %6 = vector.extract_strided_slice %3 {offsets = [8, 0], sizes = [1, 1024], strides = [1, 1]} : vector<11x1024xf32> to vector<1x1024xf32>
    %7 = vector.extract_strided_slice %3 {offsets = [9, 0], sizes = [1, 1024], strides = [1, 1]} : vector<11x1024xf32> to vector<1x1024xf32>
    %8 = arith.mulf %4, %4 : vector<1x1024xf32>
    %9 = arith.mulf %5, %5 : vector<1x1024xf32>
    %10 = arith.addf %8, %9 : vector<1x1024xf32>
    %11 = arith.mulf %6, %6 : vector<1x1024xf32>
    %12 = arith.addf %10, %11 : vector<1x1024xf32>
    %13 = arith.mulf %7, %7 : vector<1x1024xf32>
    %14 = arith.addf %12, %13 : vector<1x1024xf32>
    %cst = arith.constant 1.000000e-24 : f32
    %15 = vector.broadcast %cst : f32 to vector<1x1024xf32>
    %16 = arith.maximumf %14, %15 : vector<1x1024xf32>
    %17 = math.rsqrt %16 : vector<1x1024xf32>
    %18 = tpu.iota {dimensions = array<i32: 0>} : vector<11x1024xi32>
    %c3_i32 = arith.constant 3 : i32
    %19 = vector.broadcast %c3_i32 : i32 to vector<11x1024xi32>
    %20 = arith.cmpi slt, %18, %19 : vector<11x1024xi32>
    %c6_i32 = arith.constant 6 : i32
    %21 = vector.broadcast %c6_i32 : i32 to vector<11x1024xi32>
    %22 = arith.cmpi slt, %18, %21 : vector<11x1024xi32>
    %23 = math.exp %3 : vector<11x1024xf32>
    %c10_i32 = arith.constant 10 : i32
    %24 = vector.broadcast %c10_i32 : i32 to vector<11x1024xi32>
    %25 = arith.cmpi slt, %18, %24 : vector<11x1024xi32>
    %26 = vector.broadcast %17 : vector<1x1024xf32> to vector<11x1024xf32>
    %27 = arith.mulf %3, %26 : vector<11x1024xf32>
    %28 = arith.negf %3 : vector<11x1024xf32>
    %29 = math.exp %28 : vector<11x1024xf32>
    %cst_1 = arith.constant 1.000000e+00 : f32
    %30 = vector.broadcast %cst_1 : f32 to vector<11x1024xf32>
    %31 = arith.addf %30, %29 : vector<11x1024xf32>
    %32 = arith.divf %30, %31 : vector<11x1024xf32>
    %33 = arith.select %25, %27, %32 : vector<11x1024xi1>, vector<11x1024xf32>
    %34 = arith.select %22, %23, %33 : vector<11x1024xi1>, vector<11x1024xf32>
    %35 = arith.select %20, %3, %34 : vector<11x1024xi1>, vector<11x1024xf32>
    %c0_2 = arith.constant 0 : index
    %c0_3 = arith.constant 0 : index
    %36 = vector.load %arg2[%c0_2, %c0_3] : memref<11x1024xf32, #tpu.memory_space<vmem>>, vector<11x1024xf32>
    tpu.vector_store %arg2[%c0_2, %c0_3], %35 {strides = array<i32>} : memref<11x1024xf32, #tpu.memory_space<vmem>>, vector<11x1024xf32>,
    return
  }
  func.func @transform_0(%arg0: i32) -> (i32, i32) {
    %c0_i32 = arith.constant 0 : i32
    %c0_i32_0 = arith.constant 0 : i32
    return %c0_i32, %arg0 : i32, i32
  }
  func.func @transform_1(%arg0: i32) -> (i32, i32) {
    %c0_i32 = arith.constant 0 : i32
    %c0_i32_0 = arith.constant 0 : i32
    return %c0_i32, %arg0 : i32, i32
  }
}

</mosaic_0001>

<bundles_post_ra>
// kernel: tpu_custom_call.1
= control target key start
LH: loop header
LB: loop body
LE: loop exit
PB: predicated region body
PF: predicated region fallthrough
CT: control target
= control target key end

     0   :  { %6 = vsyncpa [#allocation3], 0  ;;  %s1366_s0 = inlined_call_operand.hbm [shape: f32[22,4096], index: 0, kind: input, shape index: {}]   ;;  %s1367_s1 = inlined_call_operand.hbm [shape: f32[11,4096], index: 1, kind: output, shape index: {}]  }
   0x1   :  { %8 = vsyncpa [#allocation3 + $0x1], 0 }
   0x2   :  { %9 = vsyncpa [#allocation4], 0 }
   0x3   :  { %11 = vsyncpa [#allocation4 + $0x1], 0  ;;  %s954_s6 = smov 0   ;;  %s956_s7 = smov 0  }
   0x4   :  { %s958_s8 = smov 0   ;;  %s960_s9 = smov 0  }
   0x5 LB: > { %s975_s10 = sadd.s32 4294967295, %s934_s9   ;;  %s690_s11 = sadd.s32 4294967294, %s934_s9   ;;  %s934_s9 = sphi %s960_s9, %s1379_s9   ;;  %s930_s8 = sphi %s958_s8, %s1378_s8   ;;  %s926_s7 = sphi %s956_s7, %s1377_s7   ;;  %s922_s6 = sphi %s954_s6, %s1376_s6  }
   0x6   : > { %s979_s12 = sadd.s32 1, %s934_s9   ;;  %s24_s13 = sadd.s32 1, %s930_s8 }
   0x7   : > { %s21_s14 = ssub.s32 %s934_s9, %s979_s12  ;;  %p31_p0 = scmp.ne.s32.totalorder %s930_s8, %s926_s7 }
   0x8   : > { %p22_p1 = scmp.eq.s32.totalorder %s21_s14, 0  ;;  %p32_p2 = scmp.eq.s32.totalorder %s934_s9, 0 }
   0x9   : > { %p37_p3 = scmp.ne.s32.totalorder %s926_s7, %s922_s6  ;;  %p38_p4 = scmp.eq.s32.totalorder %s975_s10, 0 }
   0xa   : > { %s991_s15 = scalar_select %p22_p1, %s930_s8, %s24_s13  }
   0xb   : > { %p33_p5 = por %p32_p2, %p31_p0  ;;  %p993_p6 = por %p38_p4, %p37_p3 }
   0xc   : > { %p61_p7 = scmp.eq.s32.totalorder %s975_s10, 3  ;;  %p67_p8 = scmp.eq.s32.totalorder %s690_s11, 3 }
   0xd   : > { %p734_p9 = scmp.lt.s32.totalorder %s934_s9, 4  ;;  %s87_s19 = sand.u32 1, %s930_s8  }
   0xe   : > { %p999_p10 = por %p61_p7, %p31_p0  ;;  %p1003_p11 = por %p67_p8, %p37_p3 }
   0xf   : > { %s718_s20 = sshll.u32 %s934_s9, 10  ;;  %s720_s21 = smul.u32 192, %s87_s19 }
  0x10   : > { %s1370_s17 = scalar_select %p999_p10, 1, 0 }
  0x11   : > { %s1371_s18 = scalar_select %p1003_p11, 1, 0 }
  0x12   : > { %s1012_s24 = scalar_lea.hbm %s1366_s0, %s718_s20  ;;  %p1014_p12 = pnand %p734_p9, %p33_p5 }
  0x13   : > { %s91_s26 = scalar_lea.vmem [#allocation2], %s720_s21  ;;  %s1021_s28 = scalar_lea.sflag [#allocation3], %s87_s19 }
  0x14   : > { %s98_s27 = sshll.u32 %s91_s26, 4  ;;  %s838_s29 = scalar_lea.hbm %s1012_s24, 3072  ;;  %s1018_s27 = int_to_ptr.vmem [resolvable:$true] %s98_s27 }
  0x15   : > { %p839_p0 = scmp.ne.s32.totalorder %s1012_s24, %s838_s29  ;;  %p840_p1 = pneg %p1014_p12 }
  0x16   : > { %s843_s3 = scalar_lea.hbm %s1366_s0, 12288  ;;  %p844_p4 = scmp.lt.u32.totalorder %s1012_s24, %s1366_s0 }
  0x17   : > { %p841_p2 = pnand %p840_p1, %p839_p0  ;;  %p845_p5 = scmp.lt.u32.totalorder %s843_s3, %s838_s29 }
  0x18   : > { %p847_p8 = scmp.lt.u32.totalorder %s838_s29, %s1012_s24 }
  0x19   : > { %p842_p3 = pneg %p841_p2  ;;  %p846_p7 = por %p845_p5, %p844_p4 }
  0x1b   : > { %p848_p9 = por %p847_p8, %p846_p7 }
  0x1d   : > { %p849_p13 = pnand %p848_p9, %p842_p3 }
  0x1f   : > { %852 = shalt.err (!%p849_p13)
}
  0x20   : > { %s853_s11 = scalar_lea.vmem %s1018_s27, 3072  ;;  %s936_s13 = smov [#allocation2]  }
  0x21   : > { %p854_p0 = scmp.ne.s32.totalorder %s1018_s27, %s853_s11  ;;  %s858_s14 = sshll.u32 %s936_s13, 4  ;;  %s859_s14 = int_to_ptr.vmem [resolvable:$false] %s858_s14 }
  0x22   : > { %s860_s19 = scalar_lea.vmem %s859_s14, 6144  ;;  %p861_p10 = scmp.lt.s32.totalorder %s1018_s27, %s859_s14 }
  0x23   : > { %p856_p2 = pnand %p854_p0, %p840_p1  ;;  %p862_p4 = scmp.lt.s32.totalorder %s860_s19, %s853_s11 }
  0x25   : > { %p857_p11 = pneg %p856_p2  ;;  %p863_p5 = por %p862_p4, %p861_p10 }
  0x27   : > { %p864_p7 = pnand %p863_p5, %p857_p11 }
  0x29   : > { %867 = shalt.err (!%p864_p7)
}
  0x2a   : > { %s937_s20 = smov 4096   ;;  %s938_s21 = smov 1024  }
  0x2b   : > { %s939_s22 = smov 64   ;;  %p106_p13 = scmp.lt.s32.totalorder %s934_s9, 5 }
  0x2c   : > { %729 = dma.hbm_to_vmem [thread:$0]  (!%p1014_p12), %s1012_s24, 3072, %s1018_s27, %s1021_s28, %s937_s20, %s938_s21, %s939_s22  }
  0x2d   : > { %p1373_p1 = scmp.ge.s32.totalorder %s934_s9, 1 }
  0x2f   : > { %p107_p3 = pnand %p1373_p1, %p106_p13 }
  0x30   : > { %s1053_s23 = sand.u32 (!%p107_p3), 1, %s926_s7  }
  0x31   : > { %110 = sbr.rel (%p107_p3) target bundleno = 148 (0x94), region = 24  ;;  %s113_s29 = scalar_lea.sflag (!%p107_p3), [#allocation3], %s1053_s23 }
  0x32   : > { %s721_s26 = smul.u32 (!%p107_p3), 192, %s1053_s23 }
  0x34   : > { %s1057_s30 = scalar_lea.vmem (!%p107_p3), [#allocation2], %s721_s26 }
  0x38   : > { %913 = dma.done.wait (%p993_p6), %s113_s29, 3072  }
  0x39   : > { %915 = vsyncadd (%p993_p6), %s113_s29, 4294964224  ;;  %v354_v0 = vlaneseq  ;;  %v145_v2 = vld [vmem:[%s1057_s30 + $0x40] sm:$0xff]  ;;  %vm177_vm0 = vcmask 1044480   ;;  %v146_v8 = vld [vmem:[%s1057_s30 + $0x48] sm:$0xff]  ;;  %s696_s16 = sshll.u32 %s1053_s23, 7  ;;  %s719_s25 = sshll.u32 %s975_s10, 10 }
  0x3a   : > { %v153_v3 = vld [vmem:[%s1057_s30 + $0x80] sm:$0x3f]  ;;  %v178_v6 = vrot.slane %v145_v2, 3  ;;  %v154_v9 = vld [vmem:[%s1057_s30 + $0x88] sm:$0x3f]  ;;  %v181_v11 = vrot.slane %v146_v8, 3  ;;  %s1312_s3 = scalar_lea.hbm %s1367_s1, %s719_s25 }
  0x3b   : > { %v1063_v1 = vshrl.u32 %v354_v0, 7  ;;  %v137_v5 = vld [vmem:[%s1057_s30] sm:$0xff]  ;;  %v179_v7 = vrot.slane %v153_v3, 3  ;;  %v138_v10 = vld [vmem:[%s1057_s30 + $0x8] sm:$0xff]  ;;  %v182_v12 = vrot.slane %v154_v9, 3  ;;  %v147_v13 = vld [vmem:[%s1057_s30 + $0x50] sm:$0xff] }
  0x3c   : > { %v155_v14 = vld [vmem:[%s1057_s30 + $0x90] sm:$0x3f]  ;;  %v184_v17 = vrot.slane %v147_v13, 3  ;;  %v148_v19 = vld [vmem:[%s1057_s30 + $0x58] sm:$0xff]  ;;  %v1102_v37 = vld [vmem:[%s1057_s30 + $0x60] sm:$0xff]  ;;  %s1205_s24 = scalar_lea.vmem [#allocation5], %s696_s16 }
  0x3d   : > { %v1068_v4 = vsub.s32 6, %v1063_v1  ;;  %v180_v15 = vsel %vm177_vm0, %v178_v6, %v179_v7  ;;  %v1077_v16 = vadd.f32 %v179_v7, %v145_v2  ;;  %v185_v18 = vrot.slane %v155_v14, 3  ;;  %v139_v32 = vld [vmem:[%s1057_s30 + $0x10] sm:$0xff]  ;;  %v156_v36 = vld [vmem:[%s1057_s30 + $0x98] sm:$0x3f]  ;;  %v150_v60 = vld [vmem:[%s1057_s30 + $0x68] sm:$0xff] }
  0x3e   : > { %v1080_v20 = vadd.f32 %v180_v15, %v137_v5  ;;  %v183_v21 = vsel %vm177_vm0, %v181_v11, %v182_v12  ;;  %v1083_v22 = vadd.f32 %v182_v12, %v146_v8  ;;  %v187_v23 = vrot.slane %v148_v19, 3  ;;  %v140_v46 = vld [vmem:[%s1057_s30 + $0x18] sm:$0xff]  ;;  %v157_v59 = vld [vmem:[%s1057_s30 + $0xa0] sm:$0x3f]  ;;  %s617_s27 = sshll.u32 %s1205_s24, 4  ;;  %s604_s10 = scalar_lea.sflag [#allocation4], %s1053_s23  ;;  %s1314_s27 = int_to_ptr.vmem [resolvable:$true] %s617_s27 }
  0x3f   : > { %v274_v24 = vmul.f32 %v1077_v16, %v1077_v16  ;;  %v705_v25 = vmul.f32 -1.442695, %v1077_v16  ;;  %v1088_v26 = vadd.f32 %v183_v21, %v138_v10  ;;  %v186_v27 = vsel %vm177_vm0, %v184_v17, %v185_v18  ;;  %v141_v15 = vld [vmem:[%s1057_s30 + $0x20] sm:$0xff]  ;;  %s868_s4 = scalar_lea.vmem %s1314_s27, 2048  ;;  %p1374_p10 = scmp.ne.s32.totalorder %s1370_s17, 0 }
  0x40   : > { %v234_v28 = vmul.f32 %v1080_v20, %v1080_v20  ;;  %v361_v29 = vmul.f32 1.442695, %v1080_v20  ;;  %v275_v30 = vmul.f32 %v1083_v22, %v1083_v22  ;;  %v706_v31 = vmul.f32 -1.442695, %v1083_v22  ;;  %p869_p6 = scmp.ne.s32.totalorder %s1314_s27, %s868_s4  ;;  %s940_s5 = smov [#allocation5]  }
  0x41   : > { %v290_v33 = vrot.slane %v274_v24, 2  ;;  %v314_v34 = vrot.slane %v274_v24, 3  ;;  %774 = vpow2.f32 %v705_v25  ;;  %v235_v35 = vmul.f32 %v1088_v26, %v1088_v26  ;;  %s872_s11 = sshll.u32 %s940_s5, 4  ;;  %s873_s11 = int_to_ptr.vmem [resolvable:$false] %s872_s11 }
  0x42   : > { %v250_v38 = vrot.slane %v234_v28, 1  ;;  %776 = vpow2.f32 %v361_v29  ;;  %v291_v39 = vrot.slane %v275_v30, 2  ;;  %v315_v40 = vrot.slane %v275_v30, 3  ;;  %p870_p11 = pnand %p869_p6, %p1374_p10  ;;  %s874_s13 = scalar_lea.vmem %s873_s11, 4096 }
  0x43   : > { %v251_v41 = vrot.slane %v235_v35, 1  ;;  %v363_v42 = vmul.f32 1.442695, %v1088_v26  ;;  %778 = vpow2.f32 %v706_v31  ;;  %v1105_v43 = vadd.f32 %v186_v27, %v139_v32  ;;  %p875_p8 = scmp.lt.s32.totalorder %s1314_s27, %s873_s11  ;;  %p876_p9 = scmp.lt.s32.totalorder %s874_s13, %s868_s4 }
  0x44   : > { %v266_v44 = vadd.f32 %v250_v38, %v234_v28  ;;  %v1107_v45 = vadd.f32 %v185_v18, %v147_v13  ;;  %v188_v47 = vrot.slane %v156_v36, 3  ;;  %v190_v48 = vrot.slane %v1102_v37, 3  ;;  %v158_v28 = vld [vmem:[%s1057_s30 + $0xa8] sm:$0x3f]  ;;  %p871_p12 = pneg %p870_p11 }
  0x45   : > { %v267_v49 = vadd.f32 %v251_v41, %v235_v35  ;;  %780 = vpow2.f32 %v363_v42  ;;  %v236_v50 = vmul.f32 %v1105_v43, %v1105_v43  ;;  %v365_v51 = vmul.f32 1.442695, %v1105_v43  ;;  %p877_p0 = por %p876_p9, %p875_p8 }
  0x46   : > { %v306_v52 = vadd.f32 %v290_v33, %v266_v44  ;;  %v276_v53 = vmul.f32 %v1107_v45, %v1107_v45  ;;  %v707_v54 = vmul.f32 -1.442695, %v1107_v45  ;;  %v189_v55 = vsel %vm177_vm0, %v187_v23, %v188_v47  ;;  %v142_v44 = vld [vmem:[%s1057_s30 + $0x28] sm:$0xff] }
  0x47   : > { %v307_v56 = vadd.f32 %v291_v39, %v267_v49  ;;  %v252_v57 = vrot.slane %v236_v50, 1  ;;  %782 = vpow2.f32 %v365_v51  ;;  %v1118_v58 = vadd.f32 %v189_v55, %v140_v46  ;;  %v159_v51 = vld [vmem:[%s1057_s30 + $0xb0] sm:$0x3f]  ;;  %p878_p2 = pnand %p877_p0, %p871_p12 }
  0x48   : > { %v330_v61 = vadd.f32 %v314_v34, %v306_v52  ;;  %v292_v62 = vrot.slane %v276_v53, 2  ;;  %v316_v63 = vrot.slane %v276_v53, 3  ;;  %784 = vpow2.f32 %v707_v54 }
  0x49   : > { %v331_v0 = vadd.f32 %v315_v40, %v307_v56  ;;  %v268_v2 = vadd.f32 %v252_v57, %v236_v50  ;;  %v1122_v3 = vadd.f32 %v188_v47, %v148_v19  ;;  %v237_v5 = vmul.f32 %v1118_v58, %v1118_v58  ;;  %v151_v50 = vld [vmem:[%s1057_s30 + $0x70] sm:$0xff] }
  0x4a   : > { %v338_v6 = vmax.f32 %v330_v61, 1e-24  ;;  %v367_v7 = vmul.f32 1.442695, %v1118_v58  ;;  %v191_v8 = vrot.slane %v157_v59, 3  ;;  %v193_v9 = vrot.slane %v150_v60, 3 }
  0x4b   : > { %v775_v10 = vpop.eup %774  ;;  %v339_v11 = vmax.f32 %v331_v0, 1e-24  ;;  %v308_v12 = vadd.f32 %v292_v62, %v268_v2  ;;  %v253_v13 = vrot.slane %v237_v5, 1  ;;  %v277_v14 = vmul.f32 %v1122_v3, %v1122_v3 }
  0x4c   : > { %v1130_v17 = vpop.eup %776  ;;  %786 = vrsqrt.f32 %v338_v6  ;;  %v499_v18 = vadd.f32 1.0, %v775_v10  ;;  %v708_v19 = vmul.f32 -1.442695, %v1122_v3  ;;  %v192_v21 = vsel %vm177_vm0, %v190_v48, %v191_v8 }
  0x4d   : > { %v779_v23 = vpop.eup %778  ;;  %788 = vrsqrt.f32 %v339_v11  ;;  %v332_v24 = vadd.f32 %v316_v63, %v308_v12  ;;  %v269_v25 = vadd.f32 %v253_v13, %v237_v5  ;;  %v293_v27 = vrot.slane %v277_v14, 2 }
  0x4e   : > { %790 = vrcp.f32 %v499_v18  ;;  %v500_v29 = vadd.f32 1.0, %v779_v23  ;;  %v317_v30 = vrot.slane %v277_v14, 3  ;;  %v1135_v31 = vadd.f32 %v192_v21, %v141_v15 }
  0x4f   : > { %v1137_v32 = vpop.eup %780  ;;  %v340_v33 = vmax.f32 %v332_v24, 1e-24  ;;  %v309_v34 = vadd.f32 %v293_v27, %v269_v25  ;;  %792 = vpow2.f32 %v367_v7  ;;  %v1140_v35 = vadd.f32 %v191_v8, %v1102_v37 }
  0x50   : > { %794 = vrcp.f32 %v500_v29  ;;  %v238_v36 = vmul.f32 %v1135_v31, %v1135_v31  ;;  %v369_v38 = vmul.f32 1.442695, %v1135_v31  ;;  %v194_v39 = vrot.slane %v158_v28, 3 }
  0x51   : > { %v1145_v40 = vpop.eup %782  ;;  %vm357_vm1 = vcmp.lt.s32.totalorder %v1063_v1, 3  ;;  %796 = vrsqrt.f32 %v340_v33  ;;  %v333_v41 = vadd.f32 %v317_v30, %v309_v34  ;;  %v278_v42 = vmul.f32 %v1140_v35, %v1140_v35 }
  0x52   : > { %v709_v37 = vmul.f32 -1.442695, %v1140_v35  ;;  %v785_v46 = vpop.eup %784  ;;  %798 = vpow2.f32 %v708_v19  ;;  %v254_v47 = vrot.slane %v238_v36, 1  ;;  %v195_v48 = vsel %vm177_vm0, %v193_v9, %v194_v39  ;;  %v143_v9 = vld [vmem:[%s1057_s30 + $0x30] sm:$0xff] }
  0x53   : > { %v1153_v49 = vadd.f32 %v194_v39, %v150_v60  ;;  %v501_v52 = vadd.f32 1.0, %v785_v46  ;;  %v341_v53 = vmax.f32 %v333_v41, 1e-24  ;;  %v294_v54 = vrot.slane %v278_v42, 2 }
  0x54   : > { %v318_v55 = vrot.slane %v278_v42, 3  ;;  %v270_v56 = vadd.f32 %v254_v47, %v238_v36  ;;  %800 = vpow2.f32 %v369_v38  ;;  %v1157_v57 = vadd.f32 %v195_v48, %v142_v44  ;;  %v152_v36 = vld [vmem:[%s1057_s30 + $0x78] sm:$0xff] }
  0x55   : > { %v279_v59 = vmul.f32 %v1153_v49, %v1153_v49  ;;  %802 = vrcp.f32 %v501_v52  ;;  %v710_v61 = vmul.f32 -1.442695, %v1153_v49  ;;  %v196_v60 = vrot.slane %v151_v50, 3 }
  0x56   : > { %v197_v62 = vrot.slane %v159_v51, 3  ;;  %v787_v63 = vpop.eup %786  ;;  %804 = vrsqrt.f32 %v341_v53  ;;  %v310_v0 = vadd.f32 %v294_v54, %v270_v56  ;;  %v239_v2 = vmul.f32 %v1157_v57, %v1157_v57 }
  0x57   : > { %v1165_v5 = vadd.s32 8, %v1063_v1  ;;  %v789_v6 = vpop.eup %788  ;;  %vm359_vm2 = vcmp.lt.s32.totalorder %v1063_v1, 6  ;;  %v398_v7 = vrot.slane %v787_v63, %v1068_v4  ;;  %806 = vpow2.f32 %v709_v37 }
  0x58   : > { %v371_v8 = vmul.f32 1.442695, %v1157_v57  ;;  %v1172_v10 = vpop.eup %790  ;;  %v402_v11 = vrot.slane %v789_v6, %v1068_v4  ;;  %v334_v12 = vadd.f32 %v318_v55, %v310_v0  ;;  %v255_v13 = vrot.slane %v239_v2, 1 }
  0x59   : > { %808 = vpow2.f32 %v710_v61  ;;  %v1175_v14 = vpop.eup %792  ;;  %v427_v15 = vmul.f32 %v398_v7, %v1080_v20  ;;  %v295_v18 = vrot.slane %v279_v59, 2  ;;  %v198_v19 = vsel %vm177_vm0, %v196_v60, %v197_v62 }
  0x5a   : > { %v1179_v21 = vadd.f32 %v197_v62, %v151_v50  ;;  %v1181_v23 = vpop.eup %794  ;;  %v428_v24 = vmul.f32 %v402_v11, %v1088_v26  ;;  %v342_v25 = vmax.f32 %v334_v12, 1e-24  ;;  %v271_v27 = vadd.f32 %v255_v13, %v239_v2 }
  0x5b   : > { %v1184_v28 = vadd.f32 %v198_v19, %v143_v9  ;;  %vm394_vm3 = vcmp.lt.s32.totalorder %v1165_v5, 10  ;;  %v797_v29 = vpop.eup %796  ;;  %v555_v30 = vsel %vm359_vm2, %v1130_v17, %v427_v15  ;;  %v319_v33 = vrot.slane %v279_v59, 3  ;;  %v160_v17 = vld [vmem:[%s1057_s30 + $0xb8] sm:$0x3f] }
  0x5c   : > { %810 = vpow2.f32 %v371_v8  ;;  %v280_v34 = vmul.f32 %v1179_v21, %v1179_v21  ;;  %v799_v38 = vpop.eup %798  ;;  %v571_v39 = vsel %vm357_vm1, %v1080_v20, %v555_v30  ;;  %v556_v41 = vsel %vm359_vm2, %v1137_v32, %v428_v24  ;;  %v144_v8 = vld [vmem:[%s1057_s30 + $0x38] sm:$0xff] }
  0x5d   : > { %v1200_v42 = vrot.slane %v797_v29, %v1068_v4  ;;  %812 = vrsqrt.f32 %v342_v25  ;;  %587 = vst [vmem:[%s1205_s24] sm:$0xff] %v571_v39  ;;  %v572_v37 = vsel %vm357_vm1, %v1088_v26, %v556_v41  ;;  %v502_v20 = vadd.f32 1.0, %v799_v38 }
  0x5e   : > { %v311_v44 = vadd.f32 %v295_v18, %v271_v27  ;;  %v240_v32 = vmul.f32 %v1184_v28, %v1184_v28  ;;  %v1213_v46 = vpop.eup %800  ;;  %588 = vst [vmem:[%s1205_s24 + $0x8] sm:$0xff] %v572_v37  ;;  %v296_v48 = vrot.slane %v280_v34, 2  ;;  %v711_v50 = vmul.f32 -1.442695, %v1179_v21 }
  0x5f   : > { %v429_v47 = vmul.f32 %v1200_v42, %v1105_v43  ;;  %v199_v51 = vrot.slane %v152_v36, 3  ;;  %v803_v52 = vpop.eup %802  ;;  %814 = vrcp.f32 %v502_v20  ;;  %v200_v54 = vrot.slane %v160_v17, 3 }
  0x60   : > { %v335_v26 = vadd.f32 %v319_v33, %v311_v44  ;;  %v256_v53 = vrot.slane %v240_v32, 1  ;;  %v805_v55 = vpop.eup %804  ;;  %v320_v59 = vrot.slane %v280_v34, 3  ;;  %v435_v61 = vmul.f32 %v398_v7, %v1077_v16 }
  0x61   : > { %v557_v56 = vsel %vm359_vm2, %v1145_v40, %v429_v47  ;;  %v436_v60 = vmul.f32 %v402_v11, %v1083_v22  ;;  %v807_v62 = vpop.eup %806  ;;  %v410_v0 = vrot.slane %v805_v55, %v1068_v4  ;;  %816 = vpow2.f32 %v711_v50 }
  0x62   : > { %v573_v63 = vsel %vm357_vm1, %v1105_v43, %v557_v56  ;;  %v343_v2 = vmax.f32 %v335_v26, 1e-24  ;;  %v272_v6 = vadd.f32 %v256_v53, %v240_v32  ;;  %v503_v12 = vadd.f32 1.0, %v807_v62 }
  0x63   : > { %v809_v9 = vpop.eup %808  ;;  %589 = vst [vmem:[%s1205_s24 + $0x10] sm:$0xff] %v573_v63  ;;  %v201_v40 = vsel %vm177_vm0, %v199_v51, %v200_v54  ;;  %v1231_v13 = vadd.f32 %v200_v54, %v152_v36  ;;  %v430_v16 = vmul.f32 %v410_v0, %v1118_v58  ;;  %v547_v25 = vsel %vm394_vm3, %v435_v61, %v1172_v10 }
  0x64   : > { %818 = vrsqrt.f32 %v343_v2  ;;  %v504_v22 = vadd.f32 1.0, %v809_v9  ;;  %v312_v43 = vadd.f32 %v296_v48, %v272_v6  ;;  %v1234_v7 = vadd.f32 %v201_v40, %v144_v8  ;;  %595 = vst [vmem:[%s1205_s24 + $0x40] sm:$0x7] %v547_v25 }
  0x65   : > { %820 = vrcp.f32 %v503_v12  ;;  %v281_v11 = vmul.f32 %v1231_v13, %v1231_v13  ;;  %v712_v15 = vmul.f32 -1.442695, %v1231_v13  ;;  %v558_v19 = vsel %vm359_vm2, %v1175_v14, %v430_v16 }
  0x66   : > { %v811_v18 = vpop.eup %810  ;;  %822 = vrcp.f32 %v504_v22  ;;  %v336_v24 = vadd.f32 %v320_v59, %v312_v43  ;;  %v574_v29 = vsel %vm357_vm1, %v1118_v58, %v558_v19  ;;  %v373_v30 = vmul.f32 1.442695, %v1184_v28 }
  0x67   : > { %v813_v27 = vpop.eup %812  ;;  %v241_v33 = vmul.f32 %v1234_v7, %v1234_v7  ;;  %590 = vst [vmem:[%s1205_s24 + $0x18] sm:$0xff] %v574_v29  ;;  %v297_v36 = vrot.slane %v281_v11, 2  ;;  %824 = vpow2.f32 %v712_v15  ;;  %v548_v58 = vsel %vm394_vm3, %v436_v60, %v1181_v23 }
  0x68   : > { %v414_v14 = vrot.slane %v813_v27, %v1068_v4  ;;  %v344_v34 = vmax.f32 %v336_v24, 1e-24  ;;  %v437_v38 = vmul.f32 %v1200_v42, %v1107_v45  ;;  %v438_v39 = vmul.f32 %v410_v0, %v1122_v3  ;;  %596 = vst [vmem:[%s1205_s24 + $0x48] sm:$0x7] %v548_v58 }
  0x69   : > { %v257_v10 = vrot.slane %v241_v33, 1  ;;  %v815_v41 = vpop.eup %814  ;;  %v321_v20 = vrot.slane %v281_v11, 3 }
  0x6a   : > { %v431_v17 = vmul.f32 %v414_v14, %v1135_v31  ;;  %826 = vrsqrt.f32 %v344_v34  ;;  %v549_v44 = vsel %vm394_vm3, %v437_v38, %v803_v52  ;;  %v550_v32 = vsel %vm394_vm3, %v438_v39, %v815_v41 }
  0x6b   : > { %v273_v37 = vadd.f32 %v257_v10, %v241_v33  ;;  %828 = vpow2.f32 %v373_v30  ;;  %597 = vst [vmem:[%s1205_s24 + $0x50] sm:$0x7] %v549_v44  ;;  %598 = vst [vmem:[%s1205_s24 + $0x58] sm:$0x7] %v550_v32  ;;  %v439_v3 = vmul.f32 %v414_v14, %v1140_v35  ;;  %v817_v23 = vpop.eup %816  ;;  %v375_v35 = vmul.f32 1.442695, %v1234_v7 }
  0x6c   : > { %v559_v45 = vsel %vm359_vm2, %v1213_v46, %v431_v17  ;;  %v505_v50 = vadd.f32 1.0, %v817_v23 }
  0x6d   : > { %v575_v42 = vsel %vm357_vm1, %v1135_v31, %v559_v45  ;;  %v313_v47 = vadd.f32 %v297_v36, %v273_v37 }
  0x6e   : > { %v819_v48 = vpop.eup %818  ;;  %591 = vst [vmem:[%s1205_s24 + $0x20] sm:$0xff] %v575_v42  ;;  %830 = vrcp.f32 %v505_v50 }
  0x6f   : > { %v821_v51 = vpop.eup %820  ;;  %v418_v52 = vrot.slane %v819_v48, %v1068_v4  ;;  %v337_v26 = vadd.f32 %v321_v20, %v313_v47 }
  0x70   : > { %v823_v46 = vpop.eup %822  ;;  %v551_v53 = vsel %vm394_vm3, %v439_v3, %v821_v51 }
  0x71   : > { %v432_v54 = vmul.f32 %v418_v52, %v1157_v57  ;;  %v345_v31 = vmax.f32 %v337_v26, 1e-24  ;;  %599 = vst [vmem:[%s1205_s24 + $0x60] sm:$0x7] %v551_v53  ;;  %v440_v55 = vmul.f32 %v418_v52, %v1153_v49  ;;  %v825_v56 = vpop.eup %824 }
  0x72   : > { %v506_v61 = vadd.f32 1.0, %v825_v56 }
  0x73   : > { %v560_v59 = vsel %vm359_vm2, %v811_v18, %v432_v54  ;;  %832 = vrsqrt.f32 %v345_v31  ;;  %v552_v60 = vsel %vm394_vm3, %v440_v55, %v823_v46 }
  0x74   : > { %v827_v62 = vpop.eup %826  ;;  %v576_v63 = vsel %vm357_vm1, %v1157_v57, %v560_v59  ;;  %834 = vpow2.f32 %v375_v35  ;;  %600 = vst [vmem:[%s1205_s24 + $0x68] sm:$0x7] %v552_v60 }
  0x75   : > { %592 = vst [vmem:[%s1205_s24 + $0x28] sm:$0xff] %v576_v63  ;;  %v422_v49 = vrot.slane %v827_v62, %v1068_v4  ;;  %836 = vrcp.f32 %v506_v61  ;;  %v829_v0 = vpop.eup %828 }
  0x77   : > { %v433_v2 = vmul.f32 %v422_v49, %v1184_v28  ;;  %v441_v6 = vmul.f32 %v422_v49, %v1179_v21 }
  0x78   : > { %v831_v9 = vpop.eup %830 }
  0x79   : > { %v561_v8 = vsel %vm359_vm2, %v829_v0, %v433_v2  ;;  %v553_v12 = vsel %vm394_vm3, %v441_v6, %v831_v9 }
  0x7a   : > { %v577_v57 = vsel %vm357_vm1, %v1184_v28, %v561_v8  ;;  %601 = vst [vmem:[%s1205_s24 + $0x70] sm:$0x7] %v553_v12 }
  0x7b   : > { %593 = vst [vmem:[%s1205_s24 + $0x30] sm:$0xff] %v577_v57 }
  0x7d   : > { %v833_v40 = vpop.eup %832 }
  0x7e   : > { %v835_v16 = vpop.eup %834  ;;  %v426_v21 = vrot.slane %v833_v40, %v1068_v4 }
  0x7f   : > { %v837_v22 = vpop.eup %836 }
  0x80   : > { %v434_v43 = vmul.f32 %v426_v21, %v1234_v7  ;;  %v442_v28 = vmul.f32 %v426_v21, %v1231_v13 }
  0x82   : > { %v562_v11 = vsel %vm359_vm2, %v835_v16, %v434_v43  ;;  %v554_v4 = vsel %vm394_vm3, %v442_v28, %v837_v22 }
  0x83   : > { %v578_v13 = vsel %vm357_vm1, %v1234_v7, %v562_v11  ;;  %602 = vst [vmem:[%s1205_s24 + $0x78] sm:$0x7] %v554_v4 }
  0x84   : > { %594 = vst [vmem:[%s1205_s24 + $0x38] sm:$0xff] %v578_v13 }
  0x85   : > { %881 = shalt.err (!%p878_p2)
}
  0x86   : > { %s882_s14 = scalar_lea.hbm %s1312_s3, 2048  ;;  %s886_s21 = scalar_lea.hbm %s1367_s1, 8192 }
  0x87   : > { %p883_p4 = scmp.ne.s32.totalorder %s1312_s3, %s882_s14  ;;  %p887_p13 = scmp.lt.u32.totalorder %s1312_s3, %s1367_s1 }
  0x88   : > { %p888_p1 = scmp.lt.u32.totalorder %s886_s21, %s882_s14  ;;  %p890_p6 = scmp.lt.u32.totalorder %s882_s14, %s1312_s3 }
  0x89   : > { %p884_p5 = pnand %p883_p4, %p1374_p10 }
  0x8a   : > { %p889_p3 = por %p888_p1, %p887_p13 }
  0x8b   : > { %p885_p7 = pneg %p884_p5 }
  0x8c   : > { %p891_p11 = por %p890_p6, %p889_p3 }
  0x8e   : > { %p892_p12 = pnand %p891_p11, %p885_p7 }
  0x90   : > { %895 = shalt.err (!%p892_p12)
}
  0x91   : > { %s941_s29 = smov 1024   ;;  %s942_s30 = smov 4096  }
  0x92   : > { %s943_s16 = smov 64  }
  0x93   : > { %724 = dma.vmem_to_hbm [thread:$0]  (%p1374_p10), %s1314_s27, 2048, %s1312_s3, %s604_s10, %s941_s29, %s942_s30, %s943_s16  }
  0x94 PF: > { %p735_p8 = scmp.ge.s32.totalorder %s934_s9, 2  ;;  %s632_s24 = sand.u32 1, %s922_s6  }
  0x95   : > { %p1375_p9 = scmp.ne.s32.totalorder %s1371_s18, 0  ;;  %s633_s25 = scalar_lea.sflag [#allocation4], %s632_s24 }
  0x97   : > { %p731_p0 = pnand %p735_p8, %p1375_p9 }
  0x99   : > { %917 = dma.done.wait (!%p731_p0), %s633_s25, 2048  }
  0x9a   : > { %919 = vsyncadd (!%p731_p0), %s633_s25, 4294965248  ;;  %p14_p2 = scmp.ge.s32.totalorder %s979_s12, 6   ;;  %s1376_s6 = smov %s926_s7 }
  0x9b   : > { %s1377_s7 = smov %s930_s8  ;;  %s1378_s8 = smov %s991_s15 }
  0x9c   : > { %s1379_s9 = smov %s979_s12  ;;  %16 = sbr.rel (!%p14_p2) target bundleno = 5 (0x5), region = 69 }
  0xa3   :  { %638 = vsyncpa [#allocation3], 1 }
  0xa4   :  { %640 = vsyncpa [#allocation3 + $0x1], 1 }
  0xa5   :  { %641 = vsyncpa [#allocation4], 1 }
  0xa6   :  { %643 = vsyncpa [#allocation4 + $0x1], 1 }

</bundles_post_ra>
